<compile_context>
chip_gen: v7x
topology: tpu7x:2x2x1
jax: 0.10.0
libtpu: 0.0.40
codegen_flags: <defaults>
</compile_context>

<pallas_src>
import functools

import jax
import jax.numpy as jnp
from jax.experimental import pallas as pl
from jax.experimental.pallas import tpu as pltpu


# ----------------------------------------------------------------------------
# Pallas kernel: one (batch element, head, T_q tile) per grid step
# ----------------------------------------------------------------------------

def _mha_head_kernel(q_ref, k_ref, wq_ref, wk_ref, wv_ref, o_ref, s_ref, *, key_dim):
    """q_ref:  (1, tq, Dq)      query tile for this batch element
       k_ref:  (1, Tk, Dk)      full key slab for this batch element
       wq_ref: (1, Dq, d)       this head's W_query columns (bf16)
       wk_ref: (1, Dk, d)       this head's W_key columns   (bf16)
       wv_ref: (1, Dk, d)       this head's W_value columns (bf16)
       o_ref:  (1, 1, tq, d)    this head's output tile
       s_ref:  (1, 1, tq, Tk)   this head's softmax scores tile (f32)
    """
    scale = 1.0 / (float(key_dim) ** 0.5)

    # bf16 MXU operands, f32 accumulation.
    q = q_ref[0].astype(jnp.bfloat16)                                  # (tq, Dq)
    k = k_ref[0].astype(jnp.bfloat16)                                  # (Tk, Dk)

    qh = jnp.dot(q, wq_ref[0], preferred_element_type=jnp.float32)     # (tq, d) f32
    kh = jnp.dot(k, wk_ref[0], preferred_element_type=jnp.float32)     # (Tk, d) f32
    vh = jnp.dot(k, wv_ref[0], preferred_element_type=jnp.float32)     # (Tk, d) f32

    # (tq, d) x (Tk, d) contracted on d -> (tq, Tk); no explicit transpose.
    s = jax.lax.dot_general(
        qh.astype(jnp.bfloat16), kh.astype(jnp.bfloat16),
        (((1,), (1,)), ((), ())),
        preferred_element_type=jnp.float32) * scale

    # Numerically-stable softmax in f32; divide goes to the EUP.
    s = s - jnp.max(s, axis=-1, keepdims=True)
    e = jnp.exp(s)
    p = e * pl.reciprocal(jnp.sum(e, axis=-1, keepdims=True), approx=True)

    s_ref[0, 0] = p.astype(s_ref.dtype)                                # full (tq,Tk) tile
    o_ref[0, 0] = jnp.dot(p.astype(jnp.bfloat16), vh.astype(jnp.bfloat16),
                          preferred_element_type=jnp.float32).astype(o_ref.dtype)


# ----------------------------------------------------------------------------
# Wrapper
# ----------------------------------------------------------------------------

def _pick_tq_tile(T, pref=256):
    """Largest T_q tile <= pref that divides T and keeps the sublane dim aligned."""
    if T <= pref:
        return T
    for t in (256, 128, 64, 32, 16, 8):
        if t <= pref and T % t == 0:
            return t
    return T


def multi_head_attention(query, key, wq, wk, wv, *, num_heads, key_dim):
    """query: [N, T_q, Dq], key: [N, T_k, Dk]
    wq: [Dq, U], wk/wv: [Dk, U]   (transposed from torch's [U, D] Linear weights)
    returns (out [N, T_q, U], scores [num_heads, N, T_q, T_k])  -- matches torch.
    """
    N, Tq, Dq = query.shape
    _, Tk, Dk = key.shape
    U = wq.shape[1]
    H = num_heads
    assert U % H == 0, "num_units must be divisible by num_heads"
    d = U // H

    # Head-major weights (H, D, d), cast once to bf16 (halves weight DMA,
    # native MXU operand rate).
    wq3 = wq.reshape(Dq, H, d).transpose(1, 0, 2).astype(jnp.bfloat16)
    wk3 = wk.reshape(Dk, H, d).transpose(1, 0, 2).astype(jnp.bfloat16)
    wv3 = wv.reshape(Dk, H, d).transpose(1, 0, 2).astype(jnp.bfloat16)

    tq = _pick_tq_tile(Tq)
    n_tq = Tq // tq

    kernel = functools.partial(_mha_head_kernel, key_dim=key_dim)

    out4, scores4 = pl.pallas_call(
        kernel,
        out_shape=(
            jax.ShapeDtypeStruct((N, H, Tq, d), query.dtype),     # head-major out
            jax.ShapeDtypeStruct((N, H, Tq, Tk), jnp.float32),    # batch-major scores
        ),
        grid=(N, H, n_tq),
        in_specs=[
            pl.BlockSpec((1, tq, Dq), lambda n, h, i: (n, i, 0)),   # query tile
            pl.BlockSpec((1, Tk, Dk), lambda n, h, i: (n, 0, 0)),   # full key slab
            pl.BlockSpec((1, Dq, d), lambda n, h, i: (h, 0, 0)),    # per-head Wq
            pl.BlockSpec((1, Dk, d), lambda n, h, i: (h, 0, 0)),    # per-head Wk
            pl.BlockSpec((1, Dk, d), lambda n, h, i: (h, 0, 0)),    # per-head Wv
        ],
        out_specs=(
            pl.BlockSpec((1, 1, tq, d), lambda n, h, i: (n, h, i, 0)),
            pl.BlockSpec((1, 1, tq, Tk), lambda n, h, i: (n, h, i, 0)),
        ),
        compiler_params=pltpu.CompilerParams(
            dimension_semantics=("parallel", "parallel", "parallel"),
            vmem_limit_bytes=48 * 1024 * 1024,
        ),
    )(query, key, wq3, wk3, wv3)

    # Restore the torch return contract (cheap one-time layout ops outside the kernel).
    out = out4.transpose(0, 2, 1, 3).reshape(N, Tq, U)       # [N, T_q, num_units]
    scores = scores4.transpose(1, 0, 2, 3)                   # [H, N, T_q, T_k]
    return out, scores


# ----------------------------------------------------------------------------
# Pure-JAX reference (full f32, HIGHEST precision) for correctness checking
# ----------------------------------------------------------------------------

def _reference(query, key, wq, wk, wv, *, num_heads, key_dim):
    hp = jax.lax.Precision.HIGHEST
    q = jnp.einsum('ntd,du->ntu', query, wq, precision=hp)
    k = jnp.einsum('ntd,du->ntu', key, wk, precision=hp)
    v = jnp.einsum('ntd,du->ntu', key, wv, precision=hp)
    qs = jnp.stack(jnp.split(q, num_heads, axis=2), axis=0)
    ks = jnp.stack(jnp.split(k, num_heads, axis=2), axis=0)
    vs = jnp.stack(jnp.split(v, num_heads, axis=2), axis=0)
    s = jnp.einsum('hnqd,hnkd->hnqk', qs, ks, precision=hp) / (key_dim ** 0.5)
    s = jax.nn.softmax(s, axis=-1)
    o = jnp.einsum('hnqk,hnkd->hnqd', s, vs, precision=hp)
    o = jnp.concatenate(jnp.split(o, num_heads, axis=0), axis=3)[0]
    return o, s


# ----------------------------------------------------------------------------
# Demo
# ----------------------------------------------------------------------------

if __name__ == "__main__":
    # Small hparams consistent with the module:
    N, Tq, Tk = 2, 8, 16
    query_dim, key_dim = 16, 16
    num_units, num_heads = 32, 4

    key0 = jax.random.PRNGKey(0)
    kq, kk, k1, k2, k3 = jax.random.split(key0, 5)
    query = jax.random.normal(kq, (N, Tq, query_dim), jnp.float32)
    key_ = jax.random.normal(kk, (N, Tk, key_dim), jnp.float32)

    # torch nn.Linear(in, out, bias=False) weight is [out, in]; we pass [in, out].
    lim_q = 1.0 / (query_dim ** 0.5)
    lim_k = 1.0 / (key_dim ** 0.5)
    wq = jax.random.uniform(k1, (query_dim, num_units), jnp.float32, -lim_q, lim_q)
    wk = jax.random.uniform(k2, (key_dim, num_units), jnp.float32, -lim_k, lim_k)
    wv = jax.random.uniform(k3, (key_dim, num_units), jnp.float32, -lim_k, lim_k)

    fwd = jax.jit(functools.partial(multi_head_attention,
                                    num_heads=num_heads, key_dim=key_dim))
    out, scores = fwd(query, key_, wq, wk, wv)
    out, scores = jax.block_until_ready((out, scores))

    assert out.shape == (N, Tq, num_units), out.shape
    assert scores.shape == (num_heads, N, Tq, Tk), scores.shape
    assert bool(jnp.all(jnp.isfinite(out))) and bool(jnp.all(jnp.isfinite(scores)))

    ref_out, ref_scores = _reference(query, key_, wq, wk, wv,
                                     num_heads=num_heads, key_dim=key_dim)
    # bf16 MXU operands + approx reciprocal vs an f32 HIGHEST-precision reference:
    # use a correspondingly looser tolerance (values are O(1)).
    assert bool(jnp.allclose(out, ref_out, atol=5e-2, rtol=5e-2))
    assert bool(jnp.allclose(scores, ref_scores, atol=5e-2, rtol=5e-2))

    print("KERNEL_OK")
</pallas_src>

<mosaic_0001>
module attributes {stable_mosaic.version = 11 : i64} {
  func.func @_mha_head_kernel(%arg0: i32, %arg1: i32, %arg2: i32, %arg3: memref<1x8x16xf32, #tpu.memory_space<vmem>>, %arg4: memref<1x16x16xf32, #tpu.memory_space<vmem>>, %arg5: memref<1x16x8xbf16, #tpu.memory_space<vmem>>, %arg6: memref<1x16x8xbf16, #tpu.memory_space<vmem>>, %arg7: memref<1x16x8xbf16, #tpu.memory_space<vmem>>, %arg8: memref<1x1x8x8xf32, #tpu.memory_space<vmem>>, %arg9: memref<1x1x8x16xf32, #tpu.memory_space<vmem>>) attributes {dimension_semantics = [#tpu.dimension_semantics<parallel>, #tpu.dimension_semantics<parallel>, #tpu.dimension_semantics<parallel>], iteration_bounds = array<i64: 2, 4, 1>, scalar_prefetch = 0 : i64, scratch_operands = 0 : i64, tpu.core_type = #tpu.core_type<tc>, window_params = [{transform_indices = @transform_0, window_bounds = array<i64: 1, 8, 16>}, {transform_indices = @transform_1, window_bounds = array<i64: 1, 16, 16>}, {transform_indices = @transform_2, window_bounds = array<i64: 1, 16, 8>}, {transform_indices = @transform_3, window_bounds = array<i64: 1, 16, 8>}, {transform_indices = @transform_4, window_bounds = array<i64: 1, 16, 8>}, {transform_indices = @transform_5, window_bounds = array<i64: 1, 1, 8, 8>}, {transform_indices = @transform_6, window_bounds = array<i64: 1, 1, 8, 16>}]} {
    %c0 = arith.constant 0 : index
    %c0_0 = arith.constant 0 : index
    %c0_1 = arith.constant 0 : index
    %0 = vector.load %arg3[%c0, %c0_0, %c0_1] : memref<1x8x16xf32, #tpu.memory_space<vmem>>, vector<1x8x16xf32>
    %1 = vector.shape_cast %0 : vector<1x8x16xf32> to vector<8x16xf32>
    %2 = arith.truncf %1 : vector<8x16xf32> to vector<8x16xbf16>
    %c0_2 = arith.constant 0 : index
    %c0_3 = arith.constant 0 : index
    %c0_4 = arith.constant 0 : index
    %3 = vector.load %arg4[%c0_2, %c0_3, %c0_4] : memref<1x16x16xf32, #tpu.memory_space<vmem>>, vector<1x16x16xf32>
    %4 = vector.shape_cast %3 : vector<1x16x16xf32> to vector<16x16xf32>
    %5 = arith.truncf %4 : vector<16x16xf32> to vector<16x16xbf16>
    %c0_5 = arith.constant 0 : index
    %c0_6 = arith.constant 0 : index
    %c0_7 = arith.constant 0 : index
    %6 = vector.load %arg5[%c0_5, %c0_6, %c0_7] : memref<1x16x8xbf16, #tpu.memory_space<vmem>>, vector<1x16x8xbf16>
    %7 = vector.shape_cast %6 : vector<1x16x8xbf16> to vector<16x8xbf16>
    %cst = arith.constant dense<0.000000e+00> : vector<8x8xf32>
    %8 = tpu.matmul %2, %7, %cst {dimension_numbers = #tpu.dot_dimension_numbers<[1], [0], [0], [1], [0, 0, 1, 1], [], []>} : vector<8x16xbf16>, vector<16x8xbf16>, vector<8x8xf32> -> vector<8x8xf32>
    %c0_8 = arith.constant 0 : index
    %c0_9 = arith.constant 0 : index
    %c0_10 = arith.constant 0 : index
    %9 = vector.load %arg6[%c0_8, %c0_9, %c0_10] : memref<1x16x8xbf16, #tpu.memory_space<vmem>>, vector<1x16x8xbf16>
    %10 = vector.shape_cast %9 : vector<1x16x8xbf16> to vector<16x8xbf16>
    %cst_11 = arith.constant dense<0.000000e+00> : vector<16x8xf32>
    %11 = tpu.matmul %5, %10, %cst_11 {dimension_numbers = #tpu.dot_dimension_numbers<[1], [0], [0], [1], [0, 0, 1, 1], [], []>} : vector<16x16xbf16>, vector<16x8xbf16>, vector<16x8xf32> -> vector<16x8xf32>
    %c0_12 = arith.constant 0 : index
    %c0_13 = arith.constant 0 : index
    %c0_14 = arith.constant 0 : index
    %12 = vector.load %arg7[%c0_12, %c0_13, %c0_14] : memref<1x16x8xbf16, #tpu.memory_space<vmem>>, vector<1x16x8xbf16>
    %13 = vector.shape_cast %12 : vector<1x16x8xbf16> to vector<16x8xbf16>
    %cst_15 = arith.constant dense<0.000000e+00> : vector<16x8xf32>
    %14 = tpu.matmul %5, %13, %cst_15 {dimension_numbers = #tpu.dot_dimension_numbers<[1], [0], [0], [1], [0, 0, 1, 1], [], []>} : vector<16x16xbf16>, vector<16x8xbf16>, vector<16x8xf32> -> vector<16x8xf32>
    %15 = arith.truncf %8 : vector<8x8xf32> to vector<8x8xbf16>
    %16 = arith.truncf %11 : vector<16x8xf32> to vector<16x8xbf16>
    %cst_16 = arith.constant dense<0.000000e+00> : vector<8x16xf32>
    %17 = tpu.matmul %15, %16, %cst_16 {dimension_numbers = #tpu.dot_dimension_numbers<[1], [1], [0], [0], [0, 0, 1, 0], [], []>} : vector<8x8xbf16>, vector<16x8xbf16>, vector<8x16xf32> -> vector<8x16xf32>
    %cst_17 = arith.constant 2.500000e-01 : f32
    %18 = vector.broadcast %cst_17 : f32 to vector<8x16xf32>
    %19 = arith.mulf %17, %18 : vector<8x16xf32>
    %cst_18 = arith.constant dense<0xFF800000> : vector<8xf32>
    %20 = vector.multi_reduction <maximumf>, %19, %cst_18 [1] : vector<8x16xf32> to vector<8xf32>
    %21 = vector.shape_cast %20 : vector<8xf32> to vector<8x1xf32>
    %22 = vector.broadcast %21 : vector<8x1xf32> to vector<8x16xf32>
    %23 = arith.subf %19, %22 : vector<8x16xf32>
    %24 = math.exp %23 : vector<8x16xf32>
    %cst_19 = arith.constant dense<0.000000e+00> : vector<8xf32>
    %25 = vector.multi_reduction <add>, %24, %cst_19 [1] : vector<8x16xf32> to vector<8xf32>
    %26 = vector.shape_cast %25 : vector<8xf32> to vector<8x1xf32>
    %27 = tpu.reciprocal %26 {approx = true} : vector<8x1xf32> -> vector<8x1xf32>
    %28 = vector.broadcast %27 : vector<8x1xf32> to vector<8x16xf32>
    %29 = arith.mulf %24, %28 : vector<8x16xf32>
    %c0_20 = arith.constant 0 : index
    %c0_21 = arith.constant 0 : index
    %c0_22 = arith.constant 0 : index
    %c0_23 = arith.constant 0 : index
    %30 = vector.load %arg9[%c0_20, %c0_21, %c0_22, %c0_23] : memref<1x1x8x16xf32, #tpu.memory_space<vmem>>, vector<1x1x8x16xf32>
    %31 = vector.shape_cast %30 : vector<1x1x8x16xf32> to vector<8x16xf32>
    %32 = vector.shape_cast %29 : vector<8x16xf32> to vector<1x1x8x16xf32>
    tpu.vector_store %arg9[%c0_20, %c0_21, %c0_22, %c0_23], %32 {strides = array<i32>} : memref<1x1x8x16xf32, #tpu.memory_space<vmem>>, vector<1x1x8x16xf32>,
    %33 = arith.truncf %29 : vector<8x16xf32> to vector<8x16xbf16>
    %34 = arith.truncf %14 : vector<16x8xf32> to vector<16x8xbf16>
    %cst_24 = arith.constant dense<0.000000e+00> : vector<8x8xf32>
    %35 = tpu.matmul %33, %34, %cst_24 {dimension_numbers = #tpu.dot_dimension_numbers<[1], [0], [0], [1], [0, 0, 1, 1], [], []>} : vector<8x16xbf16>, vector<16x8xbf16>, vector<8x8xf32> -> vector<8x8xf32>
    %c0_25 = arith.constant 0 : index
    %c0_26 = arith.constant 0 : index
    %c0_27 = arith.constant 0 : index
    %c0_28 = arith.constant 0 : index
    %36 = vector.load %arg8[%c0_25, %c0_26, %c0_27, %c0_28] : memref<1x1x8x8xf32, #tpu.memory_space<vmem>>, vector<1x1x8x8xf32>
    %37 = vector.shape_cast %36 : vector<1x1x8x8xf32> to vector<8x8xf32>
    %38 = vector.shape_cast %35 : vector<8x8xf32> to vector<1x1x8x8xf32>
    tpu.vector_store %arg8[%c0_25, %c0_26, %c0_27, %c0_28], %38 {strides = array<i32>} : memref<1x1x8x8xf32, #tpu.memory_space<vmem>>, vector<1x1x8x8xf32>,
    return
  }
  func.func @transform_0(%arg0: i32, %arg1: i32, %arg2: i32) -> (i32, i32, i32) {
    %c0_i32 = arith.constant 0 : i32
    %c0_i32_0 = arith.constant 0 : i32
    return %arg0, %arg2, %c0_i32 : i32, i32, i32
  }
  func.func @transform_1(%arg0: i32, %arg1: i32, %arg2: i32) -> (i32, i32, i32) {
    %c0_i32 = arith.constant 0 : i32
    %c0_i32_0 = arith.constant 0 : i32
    %c0_i32_1 = arith.constant 0 : i32
    return %arg0, %c0_i32, %c0_i32_0 : i32, i32, i32
  }
  func.func @transform_2(%arg0: i32, %arg1: i32, %arg2: i32) -> (i32, i32, i32) {
    %c0_i32 = arith.constant 0 : i32
    %c0_i32_0 = arith.constant 0 : i32
    %c0_i32_1 = arith.constant 0 : i32
    return %arg1, %c0_i32, %c0_i32_0 : i32, i32, i32
  }
  func.func @transform_3(%arg0: i32, %arg1: i32, %arg2: i32) -> (i32, i32, i32) {
    %c0_i32 = arith.constant 0 : i32
    %c0_i32_0 = arith.constant 0 : i32
    %c0_i32_1 = arith.constant 0 : i32
    return %arg1, %c0_i32, %c0_i32_0 : i32, i32, i32
  }
  func.func @transform_4(%arg0: i32, %arg1: i32, %arg2: i32) -> (i32, i32, i32) {
    %c0_i32 = arith.constant 0 : i32
    %c0_i32_0 = arith.constant 0 : i32
    %c0_i32_1 = arith.constant 0 : i32
    return %arg1, %c0_i32, %c0_i32_0 : i32, i32, i32
  }
  func.func @transform_5(%arg0: i32, %arg1: i32, %arg2: i32) -> (i32, i32, i32, i32) {
    %c0_i32 = arith.constant 0 : i32
    %c0_i32_0 = arith.constant 0 : i32
    return %arg0, %arg1, %arg2, %c0_i32 : i32, i32, i32, i32
  }
  func.func @transform_6(%arg0: i32, %arg1: i32, %arg2: i32) -> (i32, i32, i32, i32) {
    %c0_i32 = arith.constant 0 : i32
    %c0_i32_0 = arith.constant 0 : i32
    return %arg0, %arg1, %arg2, %c0_i32 : i32, i32, i32, i32
  }
}

</mosaic_0001>

<bundles_post_ra>
// kernel: multi_head_attention.1
= control target key start
LH: loop header
LB: loop body
LE: loop exit
PB: predicated region body
PF: predicated region fallthrough
CT: control target
= control target key end

     0   :  { %s1070_s21 = smov 0   ;;  %s1072_s22 = smov 0   ;;  %s1170_s0 = inlined_call_operand.vmem [shape: f32[2,8,16], index: 0, kind: input, shape index: {}]   ;;  %s1171_s1 = inlined_call_operand.vmem [shape: f32[2,16,16], index: 1, kind: input, shape index: {}]   ;;  %s1172_s2 = inlined_call_operand.vmem [shape: bf16[4,16,8], index: 2, kind: input, shape index: {}]   ;;  %s1173_s3 = inlined_call_operand.vmem [shape: bf16[4,16,8], index: 3, kind: input, shape index: {}]   ;;  %s1174_s4 = inlined_call_operand.vmem [shape: bf16[4,16,8], index: 4, kind: input, shape index: {}]   ;;  %s1175_s5 = inlined_call_operand.vmem [shape: f32[2,4,8,8], index: 5, kind: output, shape index: {0}]   ;;  %s1176_s6 = inlined_call_operand.vmem [shape: f32[2,4,8,16], index: 6, kind: output, shape index: {1}]  }
   0x1   :  { %s1074_s23 = smov 0   ;;  %s1076_s24 = smov 0  }
   0x2   :  { %s1078_s25 = smov 0  }
   0x3 LB: > { %s32_s26 = sadd.s32 1, %s1023_s23  ;;  %s36_s27 = sadd.s32 1, %s1027_s24  ;;  %s1031_s25 = sphi %s1078_s25, %s17_s25   ;;  %s1027_s24 = sphi %s1076_s24, %s1180_s24   ;;  %s1023_s23 = sphi %s1074_s23, %s1179_s23   ;;  %s1019_s22 = sphi %s1072_s22, %s1178_s22   ;;  %s1015_s21 = sphi %s1070_s21, %s1177_s21  }
   0x4   : > { %p34_p0 = scmp.ge.s32.totalorder %s32_s26, 4  ;;  %p876_p1 = scmp.ge.s32.totalorder %s1031_s25, 1 }
   0x5   : > { %p286_p2 = scmp.lt.s32.totalorder %s1031_s25, 9 }
   0x6   : > { %s1182_s26 = smov (%p34_p0, %s32_s26), 0  ;;  %s1184_s27 = smov (!%p34_p0, %s36_s27), %s1027_s24 }
   0x7   : > { %p287_p3 = pnand %p876_p1, %p286_p2  ;;  %p38_p4 = scmp.ge.s32.totalorder %s1184_s27, 2 }
   0x8   : > { %p367_p5 = scmp.lt.s32.totalorder (!%p287_p3), %s1015_s21, 3  ;;  %p355_p6 = scmp.lt.s32.totalorder (!%p287_p3), %s1019_s22, 1  ;;  %v1033_v0 = vmov (!%p287_p3), 0.0   ;;  %vm1034_vm0 = vmmov (!%p287_p3), 0   ;;  %vm418_vm1 = vcmask (!%p287_p3), 130048   ;;  %vm565_vm2 = vcmask (!%p287_p3), 64512  }
   0x9   : > { %s1186_s27 = smov (%p38_p4, %s1184_s27), 0  ;;  %290 = sbr.rel (%p287_p3) target bundleno = 993 (0x3e1), region = 40 }
   0xa   : > { %920 = vmatprep.subr.bf16.mxu1 (!%p287_p3), %v1033_v0  ;;  %922 = vmatprep.mubr.msk.bf16.mxu1 (!%p287_p3), %vm1034_vm0, %v1033_v0 }
   0xb   : > { %914 = vmatprep.subr.bf16.mxu0 (!%p287_p3), %v1033_v0  ;;  %916 = vmatprep.mubr.msk.bf16.mxu0 (!%p287_p3), %vm1034_vm0, %v1033_v0 }
  0x10   : > { %s1188_s21 = smov (!%p367_p5, %s1015_s21), 3  ;;  %s1190_s22 = smov (!%p355_p6, %s1019_s22), 1 }
  0x11   : > { %s1107_s28 = sshll.u32 %s1188_s21, 3  ;;  %s900_s11 = sshll.u32 %s1190_s22, 4 }
  0x12   : > { %s376_s7 = scalar_lea.vmem %s1173_s3, %s1107_s28  ;;  %s381_s10 = scalar_lea.vmem %s1174_s4, %s1107_s28 }
  0x13   : > { %v986_v1 = vld [vmem:[%s376_s7] sm:$0xff]   ;;  %s371_s14 = scalar_lea.vmem %s1172_s2, %s1107_s28  ;;  %s366_s17 = scalar_lea.vmem %s1171_s1, %s900_s11 }
  0x14   : > { %v987_v2 = vld [vmem:[%s371_s14] sm:$0xff]   ;;  %s877_s18 = sshll.u32 %s1190_s22, 3  ;;  %921 = vmatpush3.bf16.msra.mxu1 %v986_v1  ;;  %v408_v4 = vld [vmem:[%s366_s17 + $0x8] sm:$0xff]  ;;  %s886_s28 = sshll.u32 %s1190_s22, 2 }
  0x15   : > { %v407_v3 = vld [vmem:[%s366_s17] sm:$0xff]  ;;  %s361_s29 = scalar_lea.vmem %s1170_s0, %s877_s18  ;;  %915 = vmatpush3.bf16.msra.mxu0 %v987_v2  ;;  %932 = vmatprep.subr.bf16.mxu1 %v1033_v0  ;;  %s390_s8 = sadd.s32 %s886_s28, %s1188_s21 }
  0x16   : > { %v409_v5 = vpack.c.bf16 %v408_v4, %v407_v3  ;;  %v405_v6 = vld [vmem:[%s361_s29] sm:$0xff]  ;;  %926 = vmatprep.subr.bf16.mxu0 %v1033_v0  ;;  %s887_s9 = sshll.u32 %s390_s8, 3 }
  0x17   : > { %v406_v7 = vpack.c.bf16 %v405_v6, %v405_v6  ;;  %v988_v19 = vld [vmem:[%s381_s10] sm:$0xff]   ;;  %s403_s12 = scalar_lea.vmem %s1176_s6, %s887_s9  ;;  %s392_s15 = scalar_lea.vmem %s1175_s5, %s887_s9 }
  0x18   : > { %923 = vmatmul.mubr.msk.bf16.vlgmr.msra.gmra.mrb[0].mxu1 %vm418_vm1, %v409_v5 }
  0x19   : > { %917 = vmatmul.mubr.msk.bf16.vlgmr.msra.gmra.mrb[0].mxu0 %vm418_vm1, %v406_v7  ;;  %934 = vmatprep.mubr.msk.bf16.mxu1 %vm1034_vm0, %v1033_v0 }
  0x1a   : > { %928 = vmatprep.mubr.msk.bf16.mxu0 %vm1034_vm0, %v1033_v0  ;;  %927 = vmatpush3.bf16.msra.mxu0 %v988_v19 }
  0x1b   : > { %938 = vmatprep.subr.bf16.mxu0 %v1033_v0 }
  0x21   : > { %929 = vmatmul.mubr.msk.bf16.vlgmr.msra.gmra.mrb[4].mxu0 %vm418_vm1, %v409_v5 }
  0x22   : > { %940 = vmatprep.mubr.msk.bf16.mxu0 %vm1034_vm0, %v1033_v0 }
  0xeb   : > { %v507_v8 = vpop.f32.mrb[0].mxu1 }
  0xec   : > { %v924_v9 = vpop.f32.mrb[1].mxu1  ;;  %v456_v10 = vpop.f32.mrb[0].mxu0 }
  0xed   : > { %v510_v11 = vpop.f32.mrb[2].mxu1  ;;  %v918_v12 = vpop.f32.mrb[1].mxu0  ;;  %v563_v18 = vpack.c.bf16 %v456_v10, %v456_v10 }
  0xee   : > { %v564_v13 = vpack.c.bf16 %v510_v11, %v507_v8  ;;  %v925_v14 = vpop.f32.mrb[3].mxu1  ;;  %v459_v15 = vpop.f32.mrb[2].mxu0 }
  0xef   : > { %v919_v16 = vpop.f32.mrb[3].mxu0 }
  0xf0   : > { %v570_v17 = vsel %vm565_vm2, %v564_v13, 0 }
  0xf1   : > { %933 = vmatpush3.bf16.xpose.msra.mxu1 %v570_v17 }
  0xf4   : > { %v556_v31 = vpop.f32.mrb[4].mxu0 }
  0xf5   : > { %v930_v32 = vpop.f32.mrb[5].mxu0 }
  0xf6   : > { %v559_v33 = vpop.f32.mrb[6].mxu0 }
  0xf7   : > { %v931_v34 = vpop.f32.mrb[7].mxu0  ;;  %v626_v35 = vpack.c.bf16 %v559_v33, %v556_v31 }
  0xf8   : > { %935 = vmatmul.mubr.msk.bf16.vlgmr.msra.gmra.mrb[4].mxu1 %vm565_vm2, %v563_v18 }
  0xf9   : > { %939 = vmatpush3.bf16.msra.mxu0 %v626_v35 }
 0x1cb   : > { %v606_v20 = vpop.f32.mrb[4].mxu1 }
 0x1cc   : > { %v612_v21 = vmul.f32 0.25, %v606_v20  ;;  %v936_v22 = vpop.f32.mrb[5].mxu1 }
 0x1cd   : > { %v609_v23 = vpop.f32.mrb[6].mxu1 }
 0x1ce   : > { %v937_v24 = vpop.f32.mrb[7].mxu1  ;;  %v613_v25 = vsel %vm418_vm1, %v612_v21, -inf }
 0x1cf   : > { %614 = vmax.xlane.f32.xlu0 %v613_v25 }
 0x25c   : > { %v615_v26 = vpop.xlane.xlu0 %614 }
 0x25d   : > { %v616_v27 = vsub.f32 %v612_v21, %v615_v26 }
 0x25f   : > { %v617_v28 = vmul.f32 1.442695, %v616_v27 }
 0x261   : > { %989 = vpow2.f32 %v617_v28 }
 0x26b   : > { %v990_v29 = vpop.eup %989 }
 0x26c   : > { %v619_v30 = vsel %vm418_vm1, %v990_v29, 0.0 }
 0x26d   : > { %620 = vadd.xlane.f32.xlu0 %v619_v30 }
 0x2fa   : > { %v621_v36 = vpop.xlane.xlu0 %620 }
 0x2fb   : > { %991 = vrcp.f32 %v621_v36 }
 0x305   : > { %v992_v37 = vpop.eup %991 }
 0x306   : > { %v623_v38 = vmul.f32 %v992_v37, %v990_v29 }
 0x308   : > { %v625_v39 = vpack.c.bf16 %v623_v38, %v623_v38  ;;  %624 = vst.msk [vmem:[%s403_s12] sm:$0xff] %vm418_vm1, %v623_v38 }
 0x30a   : > { %941 = vmatmul.mubr.msk.bf16.vlgmr.msra.gmra.mrb[8].mxu0 %vm418_vm1, %v625_v39 }
 0x3dd   : > { %v664_v40 = vpop.f32.mrb[8].mxu0 }
 0x3de   : > { %670 = vst.msk [vmem:[%s392_s15] sm:$0xff] %vm565_vm2, %v664_v40  ;;  %v942_v41 = vpop.f32.mrb[9].mxu0 }
 0x3df   : > { %v667_v42 = vpop.f32.mrb[10].mxu0 }
 0x3e0   : > { %v943_v43 = vpop.f32.mrb[11].mxu0 }
 0x3e1 PF: > { %s17_s25 = sadd.s32 1, %s1031_s25   ;;  %s1177_s21 = smov %s1023_s23 }
 0x3e2   : > { %p14_p7 = scmp.ge.s32.totalorder %s17_s25, 10   ;;  %s1178_s22 = smov %s1027_s24 }
 0x3e3   : > { %s1179_s23 = smov %s1182_s26  ;;  %s1180_s24 = smov %s1186_s27 }
 0x3e4   :  { %16 = sbr.rel (!%p14_p7) target bundleno = 3 (0x3), region = 94 }

</bundles_post_ra>
